<compile_context>
chip_gen: v5e
topology: v5e:2x2
jax: 0.10.0
libtpu: 0.0.40
codegen_flags: <defaults>
</compile_context>

<pallas_src>
import functools

import numpy as np
import jax
import jax.numpy as jnp
from jax import lax
from jax.experimental import pallas as pl
from jax.experimental.pallas import tpu as pltpu


def _linear_attention_kernel(x_ref, wkv_ref, bkv_ref, wq_ref, bq_ref, mask_ref,
                             o_ref, m_ref, s_ref, kv_ref, *,
                             hd, compute_dtype, approx_recip):
    # x_ref:   (1, TN, DIM)
    # wkv_ref: (DIM, 2*HD)   bkv_ref: (1, 2*HD)   (k columns, then v columns)
    # wq_ref:  (DIM, HD)     bq_ref:  (1, HD)
    # mask_ref:(HD, HD)      block-diagonal ones (DHxDH blocks per head)
    # o_ref:   (1, TN, HD)
    # scratch: m_ref (1,HD) running column max of k
    #          s_ref (1,HD) running column sum of exp(k - m)
    #          kv_ref (HD,HD) running  exp(k - m)^T @ v
    phase = pl.program_id(1)
    tile = pl.program_id(2)

    @pl.when((phase == 0) & (tile == 0))
    def _init():
        m_ref[...] = jnp.full_like(m_ref, -jnp.inf)
        s_ref[...] = jnp.zeros_like(s_ref)
        kv_ref[...] = jnp.zeros_like(kv_ref)

    x = x_ref[0].astype(compute_dtype)                          # (TN, DIM)

    # ---- Phase 0: accumulate k-softmax stats and kv over N tiles -------------
    @pl.when(phase == 0)
    def _accumulate():
        kv_proj = (jnp.dot(x, wkv_ref[...].astype(compute_dtype),
                           preferred_element_type=jnp.float32)
                   + bkv_ref[...])                              # (TN, 2*HD) f32
        k = kv_proj[:, :hd]                                     # (TN, HD)
        v = kv_proj[:, hd:]                                     # (TN, HD)

        m_old = m_ref[...]                                      # (1, HD)
        m_new = jnp.maximum(m_old, jnp.max(k, axis=0, keepdims=True))
        alpha = jnp.exp(m_old - m_new)                          # (1, HD), 0 on first tile
        p = jnp.exp(k - m_new)                                  # (TN, HD)

        s_ref[...] = alpha * s_ref[...] + jnp.sum(p, axis=0, keepdims=True)
        # One whole-slab contraction over the sequence axis (single transpose),
        # all heads at once; off-diagonal head blocks are masked at use time.
        pv = lax.dot_general(p.astype(compute_dtype), v.astype(compute_dtype),
                             (((0,), (0,)), ((), ())),
                             preferred_element_type=jnp.float32)  # (HD, HD)
        kv_ref[...] = jnp.transpose(alpha) * kv_ref[...] + pv
        m_ref[...] = m_new

    # ---- Phase 1: q softmax + output per N tile ------------------------------
    @pl.when(phase == 1)
    def _emit():
        q = (jnp.dot(x, wq_ref[...].astype(compute_dtype),
                     preferred_element_type=jnp.float32)
             + bq_ref[...])                                     # (TN, HD) f32
        # Global per-row max is constant within each head's block, so the
        # per-head softmax is unchanged (shift invariance) — one reduction.
        q_exp = jnp.exp(q - jnp.max(q, axis=-1, keepdims=True))
        mask = mask_ref[...]                                    # (HD, HD)
        # Per-head row sums broadcast back to all columns via one small matmul.
        denom = jnp.dot(q_exp.astype(compute_dtype), mask.astype(compute_dtype),
                        preferred_element_type=jnp.float32)     # (TN, HD)
        # Fold the k-softmax denominator S_d (per kv row d) into q's columns so
        # no (HD,1) rescale of kv is needed here.
        q_scaled = q_exp * pl.reciprocal(denom * s_ref[...], approx=approx_recip)
        kv_blockdiag = (mask * kv_ref[...]).astype(compute_dtype)  # (HD, HD)
        out = jnp.dot(q_scaled.astype(compute_dtype), kv_blockdiag,
                      preferred_element_type=jnp.float32)       # (TN, HD)
        o_ref[0] = out.astype(o_ref.dtype)


def _pick_block_n(n, target=512):
    """Largest convenient sequence tile: whole N if small, else a multiple-of-8 divisor."""
    if n <= target:
        return n
    for tn in range(target - target % 8, 0, -8):
        if n % tn == 0:
            return tn
    return n  # no nice divisor: fall back to a single whole-sequence tile


def linear_attention(x, weight, bias, *, heads, dim_head, block_n=None,
                     compute_dtype=jnp.float32, approx_reciprocal=False):
    """x: (B, N, DIM) or (B, N, DIM, 1).  weight: (DIM, 3*heads*dim_head), bias: (3*heads*dim_head,).

    compute_dtype=jnp.bfloat16 runs the matmuls on the MXU bf16 path with f32
    accumulation (looser numerics); default float32 matches the reference at 1e-5.
    """
    has_degree_m_dim = x.ndim == 4
    if has_degree_m_dim:
        x = x[..., 0]                                           # '... 1 -> ...'
    # TODO(synk): the optional `mask` argument of the PyTorch module is not implemented.

    B, N, DIM = x.shape
    H, DH = heads, dim_head
    HD = H * DH
    assert weight.shape == (DIM, 3 * HD), weight.shape
    assert bias.shape == (3 * HD,), bias.shape

    TN = _pick_block_n(N) if block_n is None else block_n
    assert N % TN == 0, f"block_n={TN} must divide N={N}"
    NT = N // TN

    # Split the fused projection by consumer phase (q vs k|v); column layout of
    # the JAX-convention weight already matches .chunk(3) + 'b n (h d) -> b h n d'.
    w_q = weight[:, :HD]                                        # (DIM, HD)
    w_kv = weight[:, HD:]                                       # (DIM, 2*HD)
    b_q = bias[:HD].reshape(1, HD)
    b_kv = bias[HD:].reshape(1, 2 * HD)

    # Block-diagonal head mask: ones inside each head's DHxDH block.
    head_mask = jnp.asarray(np.kron(np.eye(H, dtype=np.float32),
                                    np.ones((DH, DH), dtype=np.float32)))

    kernel = functools.partial(_linear_attention_kernel, hd=HD,
                               compute_dtype=compute_dtype,
                               approx_recip=approx_reciprocal)

    cost = pl.CostEstimate(
        flops=2 * B * N * DIM * 3 * HD + 3 * (2 * B * N * HD * HD),
        transcendentals=2 * B * N * HD,
        bytes_accessed=4 * (2 * B * N * DIM + DIM * 3 * HD + 3 * HD
                            + HD * HD + B * N * HD),
    )

    out = pl.pallas_call(
        kernel,
        out_shape=jax.ShapeDtypeStruct((B, N, HD), x.dtype),
        grid_spec=pltpu.PrefetchScalarGridSpec(
            num_scalar_prefetch=0,
            grid=(B, 2, NT),                                    # batch, phase, N tile
            in_specs=[
                pl.BlockSpec((1, TN, DIM), lambda b, p, t: (b, t, 0)),   # x tile
                pl.BlockSpec((DIM, 2 * HD), lambda b, p, t: (0, 0)),     # w_kv (resident)
                pl.BlockSpec((1, 2 * HD), lambda b, p, t: (0, 0)),       # b_kv (resident)
                pl.BlockSpec((DIM, HD), lambda b, p, t: (0, 0)),         # w_q  (resident)
                pl.BlockSpec((1, HD), lambda b, p, t: (0, 0)),           # b_q  (resident)
                pl.BlockSpec((HD, HD), lambda b, p, t: (0, 0)),          # head mask (resident)
            ],
            # Phase 0 parks the output window on tile 0 (never written there);
            # phase 1 visits each output tile exactly once and overwrites it.
            out_specs=pl.BlockSpec((1, TN, HD), lambda b, p, t: (b, p * t, 0)),
            scratch_shapes=[
                pltpu.VMEM((1, HD), jnp.float32),     # running column max of k
                pltpu.VMEM((1, HD), jnp.float32),     # running column sum of exp(k - m)
                pltpu.VMEM((HD, HD), jnp.float32),    # running kv accumulator
            ],
        ),
        compiler_params=pltpu.CompilerParams(
            dimension_semantics=("parallel", "arbitrary", "arbitrary"),
            vmem_limit_bytes=48 * 1024 * 1024,        # above 16/32 MiB defaults, below v7x physical
        ),
        cost_estimate=cost,
    )(x, w_kv, b_kv, w_q, b_q, head_mask)

    if has_degree_m_dim:
        out = out[..., None]                                    # '... -> ... 1'
    return out


def _reference(x, weight, bias, heads):
    # Pure-JAX reference of the PyTorch forward (mask=None path).
    qkv = x @ weight + bias
    q, k, v = jnp.split(qkv, 3, axis=-1)

    def resh(t):
        b, n, hd = t.shape
        return t.reshape(b, n, heads, hd // heads).transpose(0, 2, 1, 3)

    q, k, v = map(resh, (q, k, v))
    k = jax.nn.softmax(k, axis=-2)
    q = jax.nn.softmax(q, axis=-1)
    kv = jnp.einsum('bhnd,bhne->bhde', k, v)
    out = jnp.einsum('bhde,bhnd->bhne', kv, q)
    b, h, n, d = out.shape
    return out.transpose(0, 2, 1, 3).reshape(b, n, h * d)


if __name__ == "__main__":
    B, N, DIM = 2, 8, 32
    HEADS, DIM_HEAD = 4, 16
    DIM_INNER = HEADS * DIM_HEAD

    key = jax.random.PRNGKey(0)
    kx, kw, kb, kx2 = jax.random.split(key, 4)
    x = jax.random.normal(kx, (B, N, DIM), dtype=jnp.float32)
    weight = (jax.random.normal(kw, (DIM, 3 * DIM_INNER), dtype=jnp.float32)
              * (1.0 / jnp.sqrt(DIM)))
    bias = jax.random.normal(kb, (3 * DIM_INNER,), dtype=jnp.float32) * 0.01

    ref = _reference(x, weight, bias, HEADS)

    # 1) f32 path, single N tile.
    out = jax.block_until_ready(
        linear_attention(x, weight, bias, heads=HEADS, dim_head=DIM_HEAD))
    assert out.shape == (B, N, DIM_INNER), out.shape
    assert jnp.allclose(out, ref, atol=1e-5, rtol=1e-5), "f32 mismatch vs reference"

    # 2) f32 path, multiple N tiles (exercises flash-style cross-tile k-softmax).
    N2 = 32
    x2 = jax.random.normal(kx2, (B, N2, DIM), dtype=jnp.float32)
    ref2 = _reference(x2, weight, bias, HEADS)
    out2 = jax.block_until_ready(
        linear_attention(x2, weight, bias, heads=HEADS, dim_head=DIM_HEAD, block_n=8))
    assert jnp.allclose(out2, ref2, atol=1e-5, rtol=1e-5), "tiled mismatch vs reference"

    # 3) 4-D '... 1' input path.
    out4 = jax.block_until_ready(
        linear_attention(x[..., None], weight, bias, heads=HEADS, dim_head=DIM_HEAD))
    assert out4.shape == (B, N, DIM_INNER, 1), out4.shape
    assert jnp.allclose(out4[..., 0], ref, atol=1e-5, rtol=1e-5), "4-D path mismatch"

    # 4) bf16 MXU path with approx reciprocal (looser, re-validated tolerance).
    out_bf16 = jax.block_until_ready(
        linear_attention(x, weight, bias, heads=HEADS, dim_head=DIM_HEAD,
                         compute_dtype=jnp.bfloat16, approx_reciprocal=True))
    assert jnp.allclose(out_bf16, ref, atol=1e-1, rtol=1e-1), "bf16 mismatch vs reference"

    print("KERNEL_OK")
</pallas_src>

<mosaic_0001>
module attributes {stable_mosaic.version = 11 : i64} {
  func.func @_linear_attention_kernel(%arg0: i32, %arg1: i32, %arg2: i32, %arg3: memref<1x8x32xf32, #tpu.memory_space<vmem>>, %arg4: memref<32x128xf32, #tpu.memory_space<vmem>>, %arg5: memref<1x128xf32, #tpu.memory_space<vmem>>, %arg6: memref<32x64xf32, #tpu.memory_space<vmem>>, %arg7: memref<1x64xf32, #tpu.memory_space<vmem>>, %arg8: memref<64x64xf32, #tpu.memory_space<vmem>>, %arg9: memref<1x8x64xf32, #tpu.memory_space<vmem>>, %arg10: memref<1x64xf32, #tpu.memory_space<vmem>>, %arg11: memref<1x64xf32, #tpu.memory_space<vmem>>, %arg12: memref<64x64xf32, #tpu.memory_space<vmem>>) attributes {dimension_semantics = [#tpu.dimension_semantics<parallel>, #tpu.dimension_semantics<arbitrary>, #tpu.dimension_semantics<arbitrary>], iteration_bounds = array<i64: 2, 2, 1>, scalar_prefetch = 0 : i64, scratch_operands = 3 : i64, tpu.core_type = #tpu.core_type<tc>, window_params = [{transform_indices = @transform_0, window_bounds = array<i64: 1, 8, 32>}, {pipeline_mode = #tpu.pipeline_mode<synchronous>, transform_indices = @transform_1, window_bounds = array<i64: 32, 128>}, {pipeline_mode = #tpu.pipeline_mode<synchronous>, transform_indices = @transform_2, window_bounds = array<i64: 1, 128>}, {pipeline_mode = #tpu.pipeline_mode<synchronous>, transform_indices = @transform_3, window_bounds = array<i64: 32, 64>}, {pipeline_mode = #tpu.pipeline_mode<synchronous>, transform_indices = @transform_4, window_bounds = array<i64: 1, 64>}, {pipeline_mode = #tpu.pipeline_mode<synchronous>, transform_indices = @transform_5, window_bounds = array<i64: 64, 64>}, {transform_indices = @transform_6, window_bounds = array<i64: 1, 8, 64>}]} {
    %c0_i32 = arith.constant 0 : i32
    %0 = arith.cmpi eq, %arg1, %c0_i32 : i32
    %c0_i32_0 = arith.constant 0 : i32
    %1 = arith.cmpi eq, %arg2, %c0_i32_0 : i32
    %2 = arith.andi %0, %1 : i1
    %3 = arith.extui %2 : i1 to i32
    %c0_i32_1 = arith.constant 0 : i32
    %4 = arith.cmpi ne, %3, %c0_i32_1 : i32
    scf.if %4 {
      %cst = arith.constant 0xFF800000 : f32
      %13 = vector.broadcast %cst : f32 to vector<1x64xf32>
      %c0_7 = arith.constant 0 : index
      %c0_8 = arith.constant 0 : index
      %14 = vector.load %arg10[%c0_7, %c0_8] : memref<1x64xf32, #tpu.memory_space<vmem>>, vector<1x64xf32>
      tpu.vector_store %arg10[%c0_7, %c0_8], %13 {strides = array<i32>} : memref<1x64xf32, #tpu.memory_space<vmem>>, vector<1x64xf32>,
      %cst_9 = arith.constant 0.000000e+00 : f32
      %15 = vector.broadcast %cst_9 : f32 to vector<1x64xf32>
      %c0_10 = arith.constant 0 : index
      %c0_11 = arith.constant 0 : index
      %16 = vector.load %arg11[%c0_10, %c0_11] : memref<1x64xf32, #tpu.memory_space<vmem>>, vector<1x64xf32>
      tpu.vector_store %arg11[%c0_10, %c0_11], %15 {strides = array<i32>} : memref<1x64xf32, #tpu.memory_space<vmem>>, vector<1x64xf32>,
      %cst_12 = arith.constant 0.000000e+00 : f32
      %17 = vector.broadcast %cst_12 : f32 to vector<64x64xf32>
      %c0_13 = arith.constant 0 : index
      %c0_14 = arith.constant 0 : index
      %18 = vector.load %arg12[%c0_13, %c0_14] : memref<64x64xf32, #tpu.memory_space<vmem>>, vector<64x64xf32>
      tpu.vector_store %arg12[%c0_13, %c0_14], %17 {strides = array<i32>} : memref<64x64xf32, #tpu.memory_space<vmem>>, vector<64x64xf32>,
    } else {
    }
    %c0 = arith.constant 0 : index
    %c0_2 = arith.constant 0 : index
    %c0_3 = arith.constant 0 : index
    %5 = vector.load %arg3[%c0, %c0_2, %c0_3] : memref<1x8x32xf32, #tpu.memory_space<vmem>>, vector<1x8x32xf32>
    %6 = vector.shape_cast %5 : vector<1x8x32xf32> to vector<8x32xf32>
    %c0_i32_4 = arith.constant 0 : i32
    %7 = arith.cmpi eq, %arg1, %c0_i32_4 : i32
    %8 = arith.extui %7 : i1 to i32
    %c0_i32_5 = arith.constant 0 : i32
    %9 = arith.cmpi ne, %8, %c0_i32_5 : i32
    scf.if %9 {
      %c0_7 = arith.constant 0 : index
      %c0_8 = arith.constant 0 : index
      %13 = vector.load %arg4[%c0_7, %c0_8] : memref<32x128xf32, #tpu.memory_space<vmem>>, vector<32x128xf32>
      %cst = arith.constant dense<0.000000e+00> : vector<8x128xf32>
      %14 = tpu.matmul %6, %13, %cst {dimension_numbers = #tpu.dot_dimension_numbers<[1], [0], [0], [1], [0, 0, 1, 1], [], []>} : vector<8x32xf32>, vector<32x128xf32>, vector<8x128xf32> -> vector<8x128xf32>
      %c0_9 = arith.constant 0 : index
      %c0_10 = arith.constant 0 : index
      %15 = vector.load %arg5[%c0_9, %c0_10] : memref<1x128xf32, #tpu.memory_space<vmem>>, vector<1x128xf32>
      %16 = vector.broadcast %15 : vector<1x128xf32> to vector<8x128xf32>
      %17 = arith.addf %14, %16 : vector<8x128xf32>
      %18 = vector.extract_strided_slice %17 {offsets = [0, 0], sizes = [8, 64], strides = [1, 1]} : vector<8x128xf32> to vector<8x64xf32>
      %19 = vector.extract_strided_slice %17 {offsets = [0, 64], sizes = [8, 64], strides = [1, 1]} : vector<8x128xf32> to vector<8x64xf32>
      %c0_11 = arith.constant 0 : index
      %c0_12 = arith.constant 0 : index
      %20 = vector.load %arg10[%c0_11, %c0_12] : memref<1x64xf32, #tpu.memory_space<vmem>>, vector<1x64xf32>
      %cst_13 = arith.constant dense<0xFF800000> : vector<64xf32>
      %21 = vector.multi_reduction <maximumf>, %18, %cst_13 [0] : vector<8x64xf32> to vector<64xf32>
      %22 = vector.shape_cast %21 : vector<64xf32> to vector<1x64xf32>
      %23 = arith.maximumf %20, %22 : vector<1x64xf32>
      %24 = arith.subf %20, %23 : vector<1x64xf32>
      %25 = math.exp %24 : vector<1x64xf32>
      %26 = vector.broadcast %23 : vector<1x64xf32> to vector<8x64xf32>
      %27 = arith.subf %18, %26 : vector<8x64xf32>
      %28 = math.exp %27 : vector<8x64xf32>
      %c0_14 = arith.constant 0 : index
      %c0_15 = arith.constant 0 : index
      %29 = vector.load %arg11[%c0_14, %c0_15] : memref<1x64xf32, #tpu.memory_space<vmem>>, vector<1x64xf32>
      %30 = arith.mulf %25, %29 : vector<1x64xf32>
      %cst_16 = arith.constant dense<0.000000e+00> : vector<64xf32>
      %31 = vector.multi_reduction <add>, %28, %cst_16 [0] : vector<8x64xf32> to vector<64xf32>
      %32 = vector.shape_cast %31 : vector<64xf32> to vector<1x64xf32>
      %33 = arith.addf %30, %32 : vector<1x64xf32>
      %c0_17 = arith.constant 0 : index
      %c0_18 = arith.constant 0 : index
      %34 = vector.load %arg11[%c0_17, %c0_18] : memref<1x64xf32, #tpu.memory_space<vmem>>, vector<1x64xf32>
      tpu.vector_store %arg11[%c0_17, %c0_18], %33 {strides = array<i32>} : memref<1x64xf32, #tpu.memory_space<vmem>>, vector<1x64xf32>,
      %cst_19 = arith.constant dense<0.000000e+00> : vector<64x64xf32>
      %35 = tpu.matmul %28, %19, %cst_19 {dimension_numbers = #tpu.dot_dimension_numbers<[0], [0], [1], [1], [0, 1, 1, 1], [], []>} : vector<8x64xf32>, vector<8x64xf32>, vector<64x64xf32> -> vector<64x64xf32>
      %36 = tpu.transpose %25, [1, 0] : vector<1x64xf32> -> vector<64x1xf32>
      %c0_20 = arith.constant 0 : index
      %c0_21 = arith.constant 0 : index
      %37 = vector.load %arg12[%c0_20, %c0_21] : memref<64x64xf32, #tpu.memory_space<vmem>>, vector<64x64xf32>
      %38 = vector.broadcast %36 : vector<64x1xf32> to vector<64x64xf32>
      %39 = arith.mulf %38, %37 : vector<64x64xf32>
      %40 = arith.addf %39, %35 : vector<64x64xf32>
      %c0_22 = arith.constant 0 : index
      %c0_23 = arith.constant 0 : index
      %41 = vector.load %arg12[%c0_22, %c0_23] : memref<64x64xf32, #tpu.memory_space<vmem>>, vector<64x64xf32>
      tpu.vector_store %arg12[%c0_22, %c0_23], %40 {strides = array<i32>} : memref<64x64xf32, #tpu.memory_space<vmem>>, vector<64x64xf32>,
      %c0_24 = arith.constant 0 : index
      %c0_25 = arith.constant 0 : index
      %42 = vector.load %arg10[%c0_24, %c0_25] : memref<1x64xf32, #tpu.memory_space<vmem>>, vector<1x64xf32>
      tpu.vector_store %arg10[%c0_24, %c0_25], %23 {strides = array<i32>} : memref<1x64xf32, #tpu.memory_space<vmem>>, vector<1x64xf32>,
    } else {
    }
    %c1_i32 = arith.constant 1 : i32
    %10 = arith.cmpi eq, %arg1, %c1_i32 : i32
    %11 = arith.extui %10 : i1 to i32
    %c0_i32_6 = arith.constant 0 : i32
    %12 = arith.cmpi ne, %11, %c0_i32_6 : i32
    scf.if %12 {
      %c0_7 = arith.constant 0 : index
      %c0_8 = arith.constant 0 : index
      %13 = vector.load %arg6[%c0_7, %c0_8] : memref<32x64xf32, #tpu.memory_space<vmem>>, vector<32x64xf32>
      %cst = arith.constant dense<0.000000e+00> : vector<8x64xf32>
      %14 = tpu.matmul %6, %13, %cst {dimension_numbers = #tpu.dot_dimension_numbers<[1], [0], [0], [1], [0, 0, 1, 1], [], []>} : vector<8x32xf32>, vector<32x64xf32>, vector<8x64xf32> -> vector<8x64xf32>
      %c0_9 = arith.constant 0 : index
      %c0_10 = arith.constant 0 : index
      %15 = vector.load %arg7[%c0_9, %c0_10] : memref<1x64xf32, #tpu.memory_space<vmem>>, vector<1x64xf32>
      %16 = vector.broadcast %15 : vector<1x64xf32> to vector<8x64xf32>
      %17 = arith.addf %14, %16 : vector<8x64xf32>
      %cst_11 = arith.constant dense<0xFF800000> : vector<8xf32>
      %18 = vector.multi_reduction <maximumf>, %17, %cst_11 [1] : vector<8x64xf32> to vector<8xf32>
      %19 = vector.shape_cast %18 : vector<8xf32> to vector<8x1xf32>
      %20 = vector.broadcast %19 : vector<8x1xf32> to vector<8x64xf32>
      %21 = arith.subf %17, %20 : vector<8x64xf32>
      %22 = math.exp %21 : vector<8x64xf32>
      %c0_12 = arith.constant 0 : index
      %c0_13 = arith.constant 0 : index
      %23 = vector.load %arg8[%c0_12, %c0_13] : memref<64x64xf32, #tpu.memory_space<vmem>>, vector<64x64xf32>
      %cst_14 = arith.constant dense<0.000000e+00> : vector<8x64xf32>
      %24 = tpu.matmul %22, %23, %cst_14 {dimension_numbers = #tpu.dot_dimension_numbers<[1], [0], [0], [1], [0, 0, 1, 1], [], []>} : vector<8x64xf32>, vector<64x64xf32>, vector<8x64xf32> -> vector<8x64xf32>
      %c0_15 = arith.constant 0 : index
      %c0_16 = arith.constant 0 : index
      %25 = vector.load %arg11[%c0_15, %c0_16] : memref<1x64xf32, #tpu.memory_space<vmem>>, vector<1x64xf32>
      %26 = vector.broadcast %25 : vector<1x64xf32> to vector<8x64xf32>
      %27 = arith.mulf %24, %26 : vector<8x64xf32>
      %28 = tpu.reciprocal %27 : vector<8x64xf32> -> vector<8x64xf32>
      %29 = arith.mulf %22, %28 : vector<8x64xf32>
      %c0_17 = arith.constant 0 : index
      %c0_18 = arith.constant 0 : index
      %30 = vector.load %arg12[%c0_17, %c0_18] : memref<64x64xf32, #tpu.memory_space<vmem>>, vector<64x64xf32>
      %31 = arith.mulf %23, %30 : vector<64x64xf32>
      %cst_19 = arith.constant dense<0.000000e+00> : vector<8x64xf32>
      %32 = tpu.matmul %29, %31, %cst_19 {dimension_numbers = #tpu.dot_dimension_numbers<[1], [0], [0], [1], [0, 0, 1, 1], [], []>} : vector<8x64xf32>, vector<64x64xf32>, vector<8x64xf32> -> vector<8x64xf32>
      %c0_20 = arith.constant 0 : index
      %c0_21 = arith.constant 0 : index
      %c0_22 = arith.constant 0 : index
      %33 = vector.load %arg9[%c0_20, %c0_21, %c0_22] : memref<1x8x64xf32, #tpu.memory_space<vmem>>, vector<1x8x64xf32>
      %34 = vector.shape_cast %33 : vector<1x8x64xf32> to vector<8x64xf32>
      %35 = vector.shape_cast %32 : vector<8x64xf32> to vector<1x8x64xf32>
      tpu.vector_store %arg9[%c0_20, %c0_21, %c0_22], %35 {strides = array<i32>} : memref<1x8x64xf32, #tpu.memory_space<vmem>>, vector<1x8x64xf32>,
    } else {
    }
    return
  }
  func.func @transform_0(%arg0: i32, %arg1: i32, %arg2: i32) -> (i32, i32, i32) {
    %c0_i32 = arith.constant 0 : i32
    %c0_i32_0 = arith.constant 0 : i32
    return %arg0, %arg2, %c0_i32 : i32, i32, i32
  }
  func.func @transform_1(%arg0: i32, %arg1: i32, %arg2: i32) -> (i32, i32) {
    %c0_i32 = arith.constant 0 : i32
    %c0_i32_0 = arith.constant 0 : i32
    %c0_i32_1 = arith.constant 0 : i32
    return %c0_i32, %c0_i32_0 : i32, i32
  }
  func.func @transform_2(%arg0: i32, %arg1: i32, %arg2: i32) -> (i32, i32) {
    %c0_i32 = arith.constant 0 : i32
    %c0_i32_0 = arith.constant 0 : i32
    %c0_i32_1 = arith.constant 0 : i32
    return %c0_i32, %c0_i32_0 : i32, i32
  }
  func.func @transform_3(%arg0: i32, %arg1: i32, %arg2: i32) -> (i32, i32) {
    %c0_i32 = arith.constant 0 : i32
    %c0_i32_0 = arith.constant 0 : i32
    %c0_i32_1 = arith.constant 0 : i32
    return %c0_i32, %c0_i32_0 : i32, i32
  }
  func.func @transform_4(%arg0: i32, %arg1: i32, %arg2: i32) -> (i32, i32) {
    %c0_i32 = arith.constant 0 : i32
    %c0_i32_0 = arith.constant 0 : i32
    %c0_i32_1 = arith.constant 0 : i32
    return %c0_i32, %c0_i32_0 : i32, i32
  }
  func.func @transform_5(%arg0: i32, %arg1: i32, %arg2: i32) -> (i32, i32) {
    %c0_i32 = arith.constant 0 : i32
    %c0_i32_0 = arith.constant 0 : i32
    %c0_i32_1 = arith.constant 0 : i32
    return %c0_i32, %c0_i32_0 : i32, i32
  }
  func.func @transform_6(%arg0: i32, %arg1: i32, %arg2: i32) -> (i32, i32, i32) {
    %0 = arith.muli %arg1, %arg2 : i32
    %c0_i32 = arith.constant 0 : i32
    %c0_i32_0 = arith.constant 0 : i32
    return %arg0, %0, %c0_i32 : i32, i32, i32
  }
}

</mosaic_0001>

<bundles_post_ra>
// kernel: tpu_custom_call.1
= control target key start
LH: loop header
LB: loop body
LE: loop exit
PB: predicated region body
PF: predicated region fallthrough
CT: control target
= control target key end

     0   :  { %s1570_s0 = inlined_call_operand.hbm [shape: f32[2,8,32], index: 0, kind: input, shape index: {}]   ;;  %s1571_s1 = inlined_call_operand.hbm [shape: f32[32,128], index: 1, kind: input, shape index: {}]   ;;  %s1572_s2 = inlined_call_operand.vmem [shape: f32[1,128], index: 2, kind: input, shape index: {}]   ;;  %s1573_s3 = inlined_call_operand.hbm [shape: f32[32,64], index: 3, kind: input, shape index: {}]   ;;  %s1574_s4 = inlined_call_operand.vmem [shape: f32[1,64], index: 4, kind: input, shape index: {}]   ;;  %s1575_s5 = inlined_call_operand.hbm [shape: f32[64,64], index: 5, kind: input, shape index: {}]   ;;  %s1576_s6 = inlined_call_operand.hbm [shape: f32[2,8,64], index: 6, kind: output, shape index: {}]  }
   0x1   :  { %1578 = sst [smem:[#allocation20_spill]] %s1571_s1 }
   0x2   :  { %1579 = sst [smem:[#allocation21_spill]] %s1573_s3 }
   0x3   :  { %1580 = sst [smem:[#allocation22_spill]] %s1575_s5 }
   0x4   :  { %11 = vsyncpa [#allocation6], 0 }
   0x5   :  { %13 = vsyncpa [#allocation6 + $0x1], 0 }
   0x6   :  { %14 = vsyncpa [#allocation9], 0 }
   0x7   :  { %15 = vsyncpa [#allocation12], 0 }
   0x8   :  { %16 = vsyncpa [#allocation7], 0 }
   0x9   :  { %18 = vsyncpa [#allocation7 + $0x1], 0  ;;  %s1344_s21 = smov 0   ;;  %s1346_s22 = smov 0  }
   0xa   :  { %s1348_s23 = smov 0   ;;  %s1350_s24 = smov 0  }
   0xb   :  { %s1352_s25 = smov 0   ;;  %s1354_s26 = smov 0  }
   0xc   :  { %s1356_s27 = smov 0   ;;  %s1358_s28 = smov 0  }
   0xd LB: > { %1581 = sst [smem:[#allocation18_spill]] %s1290_s26  ;;  %s905_s29 = sadd.s32 4294967295, %s1298_s28   ;;  %s1298_s28 = sphi %s1358_s28, %s24_s28   ;;  %s1294_s27 = sphi %s1356_s27, %s1599_s27   ;;  %s1290_s26 = sphi %s1354_s26, %s1594_s26   ;;  %s1286_s25 = sphi %s1352_s25, %s1598_s25   ;;  %s1282_s24 = sphi %s1350_s24, %s1593_s24   ;;  %s1278_s23 = sphi %s1348_s23, %s1597_s23   ;;  %s1274_s22 = sphi %s1346_s22, %s1596_s22   ;;  %s1270_s21 = sphi %s1344_s21, %s1595_s21  }
   0xe   : > { %p907_p0 = scmp.ge.s32.totalorder %s1298_s28, 1  ;;  %p1388_p1 = scmp.eq.s32.totalorder %s905_s29, 0 }
   0xf   : > { %p211_p2 = scmp.lt.s32.totalorder %s1298_s28, 5  ;;  %s1583_s1 = sld [smem:[#allocation20_spill]] }
  0x10   : > { %s1300_s11 = smov [#allocation8]   ;;  %s1586_s3 = sld [smem:[#allocation21_spill]] }
  0x11   : > { %p1396_p3 = pnand %p907_p0, %p211_p2  ;;  %s224_s12 = sshll.u32 %s1300_s11, 4  ;;  %s225_s12 = int_to_ptr.vmem [resolvable:$true] %s224_s12 }
  0x12   : > { %s1301_s17 = smov 128   ;;  %s1302_s18 = smov 8  }
  0x13   : > { %p958_p4 = pneg %p1396_p3  ;;  %s1303_s19 = smov [#allocation10]  }
  0x14   : > { %s241_s20 = sshll.u32 %s1303_s19, 4  ;;  %s1587_s5 = sld [smem:[#allocation22_spill]]  ;;  %s242_s20 = int_to_ptr.vmem [resolvable:$true] %s241_s20 }
  0x15   : > { %s222_s9 = sshll.u32 %s1583_s1, 4  ;;  %p1404_p5 = pnand %p958_p4, %p1388_p1  ;;  %s223_s9 = int_to_ptr.hbm [resolvable:$true] %s222_s9 }
  0x16   : > { %s239_s16 = sshll.u32 %s1586_s3, 4  ;;  %s1304_s14 = smov [#allocation11]   ;;  %s240_s16 = int_to_ptr.hbm [resolvable:$true] %s239_s16 }
  0x17   : > { %961 = dma.hbm_to_vmem [thread:$0]  (!%p1404_p5), %s223_s9, 512, %s225_s12, [#allocation9], %s1301_s17, %s1301_s17, %s1302_s18  }
  0x18   : > { %964 = dma.hbm_to_vmem [thread:$0]  (!%p1404_p5), %s240_s16, 512, %s242_s20, [#allocation9], %s1301_s17, %s1301_s17, %s1302_s18  }
  0x19   : > { %s258_s15 = sshll.u32 %s1304_s14, 4  ;;  %s906_s9 = sadd.s32 4294967294, %s1298_s28   ;;  %s259_s15 = int_to_ptr.vmem [resolvable:$true] %s258_s15 }
  0x1a   : > { %s256_s11 = sshll.u32 %s1587_s5, 4  ;;  %s39_s12 = sadd.s32 1, %s1290_s26  ;;  %s257_s11 = int_to_ptr.hbm [resolvable:$true] %s256_s11 }
  0x1b   : > { %967 = dma.hbm_to_vmem [thread:$0]  (!%p1404_p5), %s257_s11, 1024, %s259_s15, [#allocation12], %s1301_s17, %s1301_s17, %s1302_s18  }
  0x1c   : > { %s43_s19 = sadd.s32 1, %s1294_s27  ;;  %p41_p6 = scmp.ge.s32.totalorder %s39_s12, 2 }
  0x1d   : > { %s52_s7 = sadd.s32 1, %s1278_s23  ;;  %p59_p7 = scmp.ne.s32.totalorder %s1278_s23, %s1274_s22 }
  0x1e   : > { %p60_p8 = scmp.eq.s32.totalorder %s1298_s28, 0  ;;  %s1601_s12 = smov (%p41_p6, %s39_s12), 0 }
  0x1f   : > { %1588 = sst [smem:[#allocation19_spill]] %s1601_s12  ;;  %s1603_s19 = smov (!%p41_p6, %s43_s19), %s1294_s27 }
  0x20   : > { %p1430_p9 = por %p60_p8, %p59_p7  ;;  %p65_p10 = scmp.ne.s32.totalorder %s1274_s22, %s1270_s21 }
  0x21   : > { %p45_p11 = scmp.ge.s32.totalorder %s1603_s19, 2  ;;  %p198_p12 = scmp.eq.s32.totalorder %s905_s29, 3 }
  0x22   : > { %p1440_p13 = por %p1388_p1, %p65_p10  ;;  %p204_p0 = scmp.eq.s32.totalorder %s906_s9, 3 }
  0x23   : > { %s1605_s19 = smov (%p45_p11, %s1603_s19), 0  ;;  %p1446_p2 = por %p198_p12, %p59_p7 }
  0x24   : > { %p1450_p4 = por %p204_p0, %p65_p10  ;;  %s47_s20 = ssub.s32 %s1294_s27, %s1605_s19 }
  0x25   : > { %p979_p5 = scmp.lt.s32.totalorder %s1298_s28, 4  ;;  %p50_p6 = scmp.eq.s32.totalorder %s47_s20, 0 }
  0x26   : > { %s272_s29 = sand.u32 1, %s1278_s23   ;;  %s913_s14 = sshll.u32 %s1294_s27, 3 }
  0x27   : > { %s912_s8 = sshll.u32 %s272_s29, 3  ;;  %s281_s1 = scalar_lea.hbm %s1570_s0, %s913_s14 }
  0x28   : > { %s1459_s11 = scalar_select %p50_p6, %s1278_s23, %s52_s7  }
  0x29   : > { %s276_s3 = scalar_lea.vmem [#allocation5], %s912_s8  ;;  %s283_s12 = sshll.u32 %s281_s1, 4  ;;  %s284_s12 = int_to_ptr.hbm [resolvable:$true] %s283_s12 }
  0x2a   : > { %s285_s5 = sshll.u32 %s276_s3, 4  ;;  %p969_p7 = pnand %p979_p5, %p1430_p9  ;;  %s286_s5 = int_to_ptr.vmem [resolvable:$true] %s285_s5 }
  0x2b   : > { %s273_s26 = scalar_lea.sflag [#allocation6], %s272_s29  ;;  %294 = sbr.rel (%p1396_p3) target bundleno = 1164 (0x48c), region = 44 }
  0x2c   : > { %971 = dma.hbm_to_vmem [thread:$0]  (!%p969_p7), %s284_s12, 128, %s286_s5, %s273_s26  }
  0x2d   : > { %s1470_s7 = sand.u32 (!%p1396_p3), 1, %s1274_s22  }
  0x2e   : > { %s915_s20 = sshll.u32 (!%p1396_p3), %s1470_s7, 3  ;;  %s297_s14 = scalar_lea.sflag (!%p1396_p3), [#allocation6], %s1470_s7 }
  0x2f   : > { %s300_s8 = scalar_lea.vmem (!%p1396_p3), [#allocation5], %s915_s20 }
  0x30   : > { %1253 = dma.done.wait (%p1440_p13), %s297_s14, 128  }
  0x31   : > { %1255 = vsyncadd (%p1440_p13), %s297_s14, 4294967168 }
  0x32   : > { %1257 = dma.done.wait (%p1388_p1), [#allocation9], 1024  }
  0x33   : > { %1259 = vsyncadd (%p1388_p1), [#allocation9], 4294966272 }
  0x34   : > { %1261 = dma.done.wait (%p1388_p1), [#allocation12], 1024  }
  0x35   : > { %1263 = vsyncadd (%p1388_p1), [#allocation12], 4294966272  ;;  %p346_p3 = scmp.eq.s32.totalorder %s1282_s24, 0  ;;  %s1487_s1 = scalar_lea.vmem [#allocation13], %s915_s20 }
  0x36   : > { %vm352_vm0 = vcmask (%p346_p3), 516096   ;;  %vm355_vm1 = vcmask (%p346_p3), 523264   ;;  %v1305_v0 = vmov (%p346_p3), -inf   ;;  %v1306_v1 = vmov (%p346_p3), 0.0  }
  0x37   : > { %351 = sbr.rel (!%p346_p3) target bundleno = 65 (0x41), region = 64  ;;  %353 = vst.msk [vmem:[#allocation2] sm:$0x1] (%p346_p3), %vm352_vm0, %v1305_v0 }
  0x38   : > { %354 = vst.msk [vmem:[#allocation3] sm:$0x1] (%p346_p3), %vm352_vm0, %v1306_v1 }
  0x39   : > { %356 = vst.msk [vmem:[#allocation4] sm:$0xff] (%p346_p3), %vm355_vm1, %v1306_v1 }
  0x3a   : > { %357 = vst.msk [vmem:[#allocation4 + $0x8] sm:$0xff] (%p346_p3), %vm355_vm1, %v1306_v1 }
  0x3b   : > { %358 = vst.msk [vmem:[#allocation4 + $0x10] sm:$0xff] (%p346_p3), %vm355_vm1, %v1306_v1 }
  0x3c   : > { %359 = vst.msk [vmem:[#allocation4 + $0x18] sm:$0xff] %vm355_vm1, %v1306_v1 }
  0x3d   : > { %360 = vst.msk [vmem:[#allocation4 + $0x20] sm:$0xff] %vm355_vm1, %v1306_v1 }
  0x3e   : > { %361 = vst.msk [vmem:[#allocation4 + $0x28] sm:$0xff] %vm355_vm1, %v1306_v1 }
  0x3f   : > { %362 = vst.msk [vmem:[#allocation4 + $0x30] sm:$0xff] %vm355_vm1, %v1306_v1 }
  0x40   : > { %363 = vst.msk [vmem:[#allocation4 + $0x38] sm:$0xff] %vm355_vm1, %v1306_v1 }
  0x41 PF: > { %v1489_v2 = vld [vmem:[%s300_s8] sm:$0xff]  ;;  %p921_p1 = scmp.ne.s32.totalorder %s1282_s24, 0 }
  0x42   : > { %s1307_s26 = smov (!%p921_p1), 64  }
  0x43   : > { %367 = sbr.rel (%p921_p1) target bundleno = 598 (0x256), region = 68 }
  0x48   : > { %v371_v3 = vld [vmem:[#allocation8 + $0x18] sm:$0xff]  ;;  %v370_v4 = vld [vmem:[#allocation8 + $0x10] sm:$0xff]  ;;  %v369_v5 = vld [vmem:[#allocation8 + $0x8] sm:$0xff]  ;;  %vm376_vm2 = vcmask 261120   ;;  %vm401_vm3 = vcmask 523264   ;;  %vm429_vm4 = vcmask 516096  }
  0x49   : > { %392 = vmatpush.msra.mxu0 %v371_v3  ;;  %v368_v6 = vld [vmem:[#allocation8] sm:$0xff]  ;;  %v1061_v7 = vld [vmem:[%s1572_s2] ss:$0 sm:$0xff]  ;;  %v419_v31 = vld [vmem:[#allocation3] sm:$0x1]  ;;  %v1308_v37 = vmov 0  }
  0x4a   : > { %v400_v16 = vld [vmem:[#allocation2] sm:$0x1]  ;;  %1059 = vset.pattern.permute.xlu2 %v1308_v37  ;;  %vm467_vm5 = vcmask 64512   ;;  %v565_v54 = vld [vmem:[#allocation4] sm:$0xff]  ;;  %v566_v60 = vld [vmem:[#allocation4 + $0x8] sm:$0xff] }
  0x4b   : > { %393 = vmatpush.msra.mxu0 %v370_v4  ;;  %v567_v1 = vld [vmem:[#allocation4 + $0x10] sm:$0xff] }
  0x4d   : > { %394 = vmatpush.msra.mxu0 %v369_v5 }
  0x4f   : > { %395 = vmatpush.msra.mxu0 %v368_v6 }
  0x50   : > { %922 = vmatmul.msk.f32.vlgmr.msra.gmra.mxu0 %vm376_vm2, %v1489_v2 }
  0xcd   : > { %v397_v8 = vpop.f32.mrf.mxu0 }
  0xce   : > { %v398_v9 = vadd.f32 %v1061_v7, %v397_v8  ;;  %v568_v7 = vld [vmem:[#allocation4 + $0x18] sm:$0xff] }
  0xd0   : > { %v402_v10 = vsel %vm401_vm3, %v398_v9, -inf  ;;  %464 = vrot.lane.b32.xlu0 %v398_v9, %s1307_s26 }
  0xd1   : > { %v403_v11 = vrot.slane %v402_v10, 4 }
  0xd3   : > { %v404_v12 = vmax.f32 %v402_v10, %v403_v11 }
  0xd5   : > { %v405_v13 = vrot.slane %v404_v12, 2 }
  0xd7   : > { %v406_v14 = vmax.f32 %v404_v12, %v405_v13  ;;  %v569_v12 = vld [vmem:[#allocation4 + $0x20] sm:$0xff] }
  0xd9   : > { %v407_v15 = vrot.slane %v406_v14, 1 }
  0xdb   : > { %v408_v17 = vmax.f32 %v406_v14, %v407_v15 }
  0xdd   : > { %v409_v18 = vmax.f32 %v400_v16, %v408_v17  ;;  %v570_v17 = vld [vmem:[#allocation4 + $0x28] sm:$0xff] }
  0xdf   : > { %v414_v19 = vperm.slane %v409_v18, 0  ;;  %637 = vst.msk [vmem:[#allocation2] sm:$0x1] %vm429_vm4, %v409_v18  ;;  %v410_v20 = vsub.f32 %v400_v16, %v409_v18 }
  0xe1   : > { %v416_v21 = vsub.f32 %v398_v9, %v414_v19  ;;  %v411_v22 = vmul.f32 1.442695, %v410_v20 }
  0xe3   : > { %v417_v23 = vmul.f32 1.442695, %v416_v21  ;;  %1062 = vpow2.f32 %v411_v22  ;;  %v571_v21 = vld [vmem:[#allocation4 + $0x30] sm:$0xff] }
  0xe5   : > { %1064 = vpow2.f32 %v417_v23 }
  0xe9   : > { %v1063_v24 = vpop.eup %1062 }
  0xea   : > { %533 = vxpose.xlu1.b32.start.end [1/1] (short) (narrow) %v1063_v24, 64  ;;  %v420_v34 = vmul.f32 %v1063_v24, %v419_v31 }
  0xeb   : > { %v1065_v25 = vpop.eup %1064 }
  0xec   : > { %v421_v26 = vsel %vm401_vm3, %v1065_v25, 0.0 }
  0xed   : > { %v422_v27 = vrot.slane %v421_v26, 4 }
  0xef   : > { %v423_v28 = vadd.f32 %v422_v27, %v421_v26  ;;  %v572_v26 = vld [vmem:[#allocation4 + $0x38] sm:$0xff] }
  0xf1   : > { %v424_v29 = vrot.slane %v423_v28, 2 }
  0xf2   : > { %431 = vxpose.xlu0.b32.start.end [1/1] (short) (narrow) %v1065_v25, 64 }
  0xf3   : > { %v425_v30 = vadd.f32 %v424_v29, %v423_v28 }
  0xf5   : > { %v426_v32 = vrot.slane %v425_v30, 1 }
  0xf7   : > { %v427_v33 = vadd.f32 %v426_v32, %v425_v30 }
  0xf9   : > { %v428_v35 = vadd.f32 %v427_v33, %v420_v34 }
  0xfb   : > { %430 = vst.msk [vmem:[#allocation3] sm:$0x1] %vm429_vm4, %v428_v35 }
 0x13d   : > { %1058 = vset.pattern.permute.xlu1 %v1308_v37 }
 0x142   : > { %v465_v36 = vpop.permute.xlu0 %464 }
 0x143   : > { %507 = vmatpush.msra.mxu1 %v465_v36  ;;  %940 = vmatpush.msra.mxu2 %v465_v36 }
 0x144   : > { %941 = vmatpush.msra.mxu3 %v465_v36 }
 0x159   : > { %1060 = vset.pattern.permute.xlu0 %v1308_v37 }
 0x18e   : > { %v549_v38 = vpop.trf.xlu1 }
 0x18f   : > { %575 = vperm.xlu1 %1058, %v549_v38  }
 0x196   : > { %v447_v39 = vpop.trf.xlu0  ;;  %v550_v40 = vpop.trf.xlu1 }
 0x197   : > { %923 = vmatmul.msk.f32.vlgmr.msra.gmra.mxu1 %vm467_vm5, %v447_v39  ;;  %580 = vperm.xlu2 %1059, %v550_v40  }
 0x19e   : > { %v448_v41 = vpop.trf.xlu0  ;;  %v551_v42 = vpop.trf.xlu1 }
 0x19f   : > { %924 = vmatmul.msk.f32.gmra.mxu1 %vm467_vm5, %v448_v41  ;;  %585 = vperm.xlu2 %1059, %v551_v42  }
 0x1a6   : > { %v449_v43 = vpop.trf.xlu0  ;;  %v552_v44 = vpop.trf.xlu1 }
 0x1a7   : > { %925 = vmatmul.msk.f32.gmra.mxu1 %vm467_vm5, %v449_v43  ;;  %590 = vperm.xlu2 %1059, %v552_v44  }
 0x1ae   : > { %v450_v45 = vpop.trf.xlu0  ;;  %v553_v46 = vpop.trf.xlu1 }
 0x1af   : > { %926 = vmatmul.msk.f32.vlgmr.msra.gmra.mxu2 %vm467_vm5, %v450_v45  ;;  %595 = vperm.xlu2 %1059, %v553_v46  }
 0x1b6   : > { %v451_v47 = vpop.trf.xlu0  ;;  %v554_v48 = vpop.trf.xlu1 }
 0x1b7   : > { %927 = vmatmul.msk.f32.gmra.mxu2 %vm467_vm5, %v451_v47  ;;  %600 = vperm.xlu2 %1059, %v554_v48  }
 0x1be   : > { %v452_v49 = vpop.trf.xlu0  ;;  %v555_v50 = vpop.trf.xlu1 }
 0x1bf   : > { %928 = vmatmul.msk.f32.gmra.mxu2 %vm467_vm5, %v452_v49  ;;  %605 = vperm.xlu2 %1059, %v555_v50  }
 0x1c6   : > { %v453_v51 = vpop.trf.xlu0  ;;  %v556_v52 = vpop.trf.xlu1 }
 0x1c7   : > { %929 = vmatmul.msk.f32.vlgmr.msra.gmra.mxu3 %vm467_vm5, %v453_v51  ;;  %610 = vperm.xlu0 %1060, %v556_v52  }
 0x1ce   : > { %v454_v53 = vpop.trf.xlu0 }
 0x1cf   : > { %930 = vmatmul.msk.f32.gmra.mxu3 %vm467_vm5, %v454_v53 }
 0x1f1   : > { %v581_v57 = vpop.permute.xlu2 %580 }
 0x1f2   : > { %v614_v61 = vmul.f32 %v581_v57, %v566_v60 }
 0x1f9   : > { %v586_v0 = vpop.permute.xlu2 %585 }
 0x1fa   : > { %v615_v3 = vmul.f32 %v586_v0, %v567_v1 }
 0x201   : > { %v576_v55 = vpop.permute.xlu1 %575  ;;  %v591_v6 = vpop.permute.xlu2 %590 }
 0x202   : > { %v613_v56 = vmul.f32 %v576_v55, %v565_v54  ;;  %v616_v8 = vmul.f32 %v591_v6, %v568_v7 }
 0x209   : > { %v596_v9 = vpop.permute.xlu2 %595 }
 0x20a   : > { %v617_v13 = vmul.f32 %v596_v9, %v569_v12 }
 0x211   : > { %v601_v16 = vpop.permute.xlu2 %600 }
 0x212   : > { %v618_v18 = vmul.f32 %v601_v16, %v570_v17 }
 0x214   : > { %v509_v58 = vpop.f32.mrf.mxu1 }
 0x215   : > { %v621_v59 = vadd.f32 %v613_v56, %v509_v58 }
 0x217   : > { %629 = vst.msk [vmem:[#allocation4] sm:$0xff] %vm401_vm3, %v621_v59 }
 0x219   : > { %v606_v22 = vpop.permute.xlu2 %605 }
 0x21a   : > { %v619_v23 = vmul.f32 %v606_v22, %v571_v21 }
 0x21c   : > { %v512_v62 = vpop.f32.mrf.mxu1 }
 0x21d   : > { %v622_v63 = vadd.f32 %v614_v61, %v512_v62 }
 0x21f   : > { %630 = vst.msk [vmem:[#allocation4 + $0x8] sm:$0xff] %vm401_vm3, %v622_v63 }
 0x224   : > { %v515_v4 = vpop.f32.mrf.mxu1 }
 0x225   : > { %v623_v5 = vadd.f32 %v615_v3, %v515_v4 }
 0x227   : > { %631 = vst.msk [vmem:[#allocation4 + $0x10] sm:$0xff] %vm401_vm3, %v623_v5 }
 0x232   : > { %v518_v10 = vpop.f32.mrf.mxu2 }
 0x233   : > { %v624_v11 = vadd.f32 %v616_v8, %v518_v10 }
 0x235   : > { %632 = vst.msk [vmem:[#allocation4 + $0x18] sm:$0xff] %vm401_vm3, %v624_v11 }
 0x239   : > { %v611_v27 = vpop.permute.xlu0 %610 }
 0x23a   : > { %v521_v14 = vpop.f32.mrf.mxu2  ;;  %v620_v28 = vmul.f32 %v611_v27, %v572_v26 }
 0x23b   : > { %v625_v15 = vadd.f32 %v617_v13, %v521_v14 }
 0x23d   : > { %633 = vst.msk [vmem:[#allocation4 + $0x20] sm:$0xff] %vm401_vm3, %v625_v15 }
 0x242   : > { %v524_v19 = vpop.f32.mrf.mxu2 }
 0x243   : > { %v626_v20 = vadd.f32 %v618_v18, %v524_v19 }
 0x245   : > { %634 = vst.msk [vmem:[#allocation4 + $0x28] sm:$0xff] %vm401_vm3, %v626_v20 }
 0x24a   : > { %v527_v24 = vpop.f32.mrf.mxu3 }
 0x24b   : > { %v627_v25 = vadd.f32 %v619_v23, %v527_v24 }
 0x24d   : > { %635 = vst.msk [vmem:[#allocation4 + $0x30] sm:$0xff] %vm401_vm3, %v627_v25 }
 0x252   : > { %v530_v29 = vpop.f32.mrf.mxu3 }
 0x253   : > { %v628_v30 = vadd.f32 %v620_v28, %v530_v29 }
 0x255   : > { %636 = vst.msk [vmem:[#allocation4 + $0x38] sm:$0xff] %vm401_vm3, %v628_v30 }
 0x256 PF: > { %p931_p8 = scmp.ne.s32.totalorder %s1282_s24, 1 }
 0x258   : > { %641 = sbr.rel (%p931_p8) target bundleno = 1149 (0x47d), region = 72 }
 0x25d   : > { %v645_v31 = vld [vmem:[#allocation10 + $0x18] sm:$0xff]  ;;  %v644_v32 = vld [vmem:[#allocation10 + $0x10] sm:$0xff]  ;;  %v643_v33 = vld [vmem:[#allocation10 + $0x8] sm:$0xff]  ;;  %vm650_vm6 = vcmask 261120   ;;  %vm674_vm7 = vcmask 523264  }
 0x25e   : > { %666 = vmatpush.msra.mxu0 %v645_v31  ;;  %v642_v34 = vld [vmem:[#allocation10] sm:$0xff]  ;;  %v688_v35 = vld [vmem:[#allocation11 + $0x38] sm:$0xff]  ;;  %v687_v36 = vld [vmem:[#allocation11 + $0x30] sm:$0xff] }
 0x25f   : > { %700 = vmatpush.msra.mxu1 %v688_v35  ;;  %v1066_v37 = vld [vmem:[%s1574_s4] ss:$0 sm:$0xff]  ;;  %v685_v42 = vld [vmem:[#allocation11 + $0x20] sm:$0xff]  ;;  %v684_v43 = vld [vmem:[#allocation11 + $0x18] sm:$0xff] }
 0x260   : > { %667 = vmatpush.msra.mxu0 %v644_v32  ;;  %v686_v41 = vld [vmem:[#allocation11 + $0x28] sm:$0xff]  ;;  %v681_v45 = vld [vmem:[#allocation11] sm:$0xff]  ;;  %v737_v54 = vld [vmem:[#allocation4 + $0x28] sm:$0xff] }
 0x261   : > { %701 = vmatpush.msra.mxu1 %v687_v36  ;;  %v682_v44 = vld [vmem:[#allocation11 + $0x8] sm:$0xff]  ;;  %v738_v52 = vld [vmem:[#allocation4 + $0x30] sm:$0xff]  ;;  %v745_v55 = vmul.f32 %v737_v54, %v686_v41  ;;  %v736_v56 = vld [vmem:[#allocation4 + $0x20] sm:$0xff] }
 0x262   : > { %668 = vmatpush.msra.mxu0 %v643_v33  ;;  %v739_v50 = vld [vmem:[#allocation4 + $0x38] sm:$0xff]  ;;  %v746_v53 = vmul.f32 %v738_v52, %v687_v36  ;;  %v744_v57 = vmul.f32 %v736_v56, %v685_v42  ;;  %v734_v59 = vld [vmem:[#allocation4 + $0x10] sm:$0xff]  ;;  %v733_v60 = vld [vmem:[#allocation4 + $0x8] sm:$0xff] }
 0x263   : > { %702 = vmatpush.msra.mxu1 %v686_v41  ;;  %v747_v51 = vmul.f32 %v739_v50, %v688_v35  ;;  %v735_v58 = vld [vmem:[#allocation4 + $0x18] sm:$0xff]  ;;  %v732_v63 = vld [vmem:[#allocation4] sm:$0xff]  ;;  %v741_v0 = vmul.f32 %v733_v60, %v682_v44 }
 0x264   : > { %669 = vmatpush.msra.mxu0 %v642_v34  ;;  %v743_v61 = vmul.f32 %v735_v58, %v684_v43  ;;  %v740_v1 = vmul.f32 %v732_v63, %v681_v45  ;;  %v1067_v3 = vld [vmem:[#allocation3] ss:$0 sm:$0xff] }
 0x265   : > { %932 = vmatmul.msk.f32.vlgmr.msra.gmra.mxu0 %vm650_vm6, %v1489_v2  ;;  %703 = vmatpush.msra.mxu1 %v685_v42  ;;  %v683_v2 = vld [vmem:[#allocation11 + $0x10] sm:$0xff] }
 0x266   : > { %759 = vmatpush.msra.mxu2 %v747_v51  ;;  %v742_v62 = vmul.f32 %v734_v59, %v683_v2 }
 0x267   : > { %704 = vmatpush.msra.mxu1 %v684_v43 }
 0x268   : > { %760 = vmatpush.msra.mxu2 %v746_v53 }
 0x269   : > { %705 = vmatpush.msra.mxu1 %v683_v2 }
 0x26a   : > { %761 = vmatpush.msra.mxu2 %v745_v55 }
 0x26b   : > { %706 = vmatpush.msra.mxu1 %v682_v44 }
 0x26c   : > { %762 = vmatpush.msra.mxu2 %v744_v57 }
 0x26d   : > { %707 = vmatpush.msra.mxu1 %v681_v45 }
 0x26e   : > { %763 = vmatpush.msra.mxu2 %v743_v61 }
 0x270   : > { %764 = vmatpush.msra.mxu2 %v742_v62 }
 0x272   : > { %765 = vmatpush.msra.mxu2 %v741_v0 }
 0x274   : > { %766 = vmatpush.msra.mxu2 %v740_v1 }
 0x2e2   : > { %v671_v38 = vpop.f32.mrf.mxu0 }
 0x2e3   : > { %v672_v39 = vadd.f32 %v1066_v37, %v671_v38 }
 0x2e5   : > { %v675_v40 = vsel %vm674_vm7, %v672_v39, -inf }
 0x2e6   : > { %676 = vmax.xlane.f32.xlu0 %v675_v40 }
 0x359   : > { %v677_v46 = vpop.xlane.xlu0 %676 }
 0x35a   : > { %v678_v47 = vsub.f32 %v672_v39, %v677_v46 }
 0x35c   : > { %v679_v48 = vmul.f32 1.442695, %v678_v47 }
 0x35e   : > { %1068 = vpow2.f32 %v679_v48 }
 0x364   : > { %v1069_v49 = vpop.eup %1068 }
 0x365   : > { %933 = vmatmul.msk.f32.vlgmr.msra.gmra.mxu1 %vm674_vm7, %v1069_v49 }
 0x3e2   : > { %v709_v4 = vpop.f32.mrf.mxu1 }
 0x3e3   : > { %v716_v5 = vmul.f32 %v1067_v3, %v709_v4 }
 0x3e5   : > { %1070 = vrcp.f32 %v716_v5  ;;  %v728_v9 = vand.u32 2147483648, %v716_v5  ;;  %v726_v11 = vand.u32 2147483647, %v716_v5  ;;  %vm722_vm9 = vweird.f32 %v716_v5 }
 0x3e7   : > { %v729_v13 = vor.u32 1.1754944e-38, %v728_v9  ;;  %vm727_vm11 = vcmp.eq.f32.partialorder %v726_v11, 8.507059e+37 }
 0x3eb   : > { %v1071_v6 = vpop.eup %1070 }
 0x3ec   : > { %v718_v7 = vmul.f32 %v1071_v6, %v716_v5  ;;  %vm723_vm8 = vweird.f32 %v1071_v6 }
 0x3ed   : > { %vm724_vm10 = vmor %vm722_vm9, %vm723_vm8 }
 0x3ee   : > { %v719_v8 = vsub.f32 1.0, %v718_v7 }
 0x3f0   : > { %v720_v10 = vmul.f32 %v1071_v6, %v719_v8 }
 0x3f2   : > { %v721_v12 = vadd.f32 %v1071_v6, %v720_v10 }
 0x3f4   : > { %v725_v14 = vsel %vm724_vm10, %v1071_v6, %v721_v12 }
 0x3f5   : > { %v730_v15 = vsel %vm727_vm11, %v729_v13, %v725_v14 }
 0x3f6   : > { %v731_v16 = vmul.f32 %v1069_v49, %v730_v15 }
 0x3f8   : > { %934 = vmatmul.msk.f32.vlgmr.msra.gmra.mxu2 %vm674_vm7, %v731_v16 }
 0x47b   : > { %v768_v17 = vpop.f32.mrf.mxu2 }
 0x47c   : > { %771 = vst.msk [vmem:[%s1487_s1] sm:$0xff] %vm674_vm7, %v768_v17 }
 0x47d PF: > { %s936_s24 = sshll.u32 %s1286_s25, 3  ;;  %s787_s29 = sshll.u32 %s1487_s1, 4  ;;  %s788_s29 = int_to_ptr.vmem [resolvable:$true] %s787_s29 }
 0x47e   : > { %s785_s13 = scalar_lea.hbm %s1576_s6, %s936_s24  ;;  %s773_s9 = scalar_lea.sflag [#allocation7], %s1470_s7 }
 0x47f   : > { %s789_s15 = sshll.u32 %s785_s13, 4  ;;  %s1212_s25 = scalar_lea.hbm %s1576_s6, 16  ;;  %s790_s15 = int_to_ptr.hbm [resolvable:$true] %s789_s15 }
 0x480   : > { %s1206_s20 = sshra.s32 %s790_s15, 4  ;;  %s1207_s20 = int_to_ptr.hbm [resolvable:$true] %s1206_s20 }
 0x481   : > { %s1208_s14 = scalar_lea.hbm %s1207_s20, 8  ;;  %p1213_p12 = scmp.lt.s32.totalorder %s1207_s20, %s1576_s6 }
 0x482   : > { %p1209_p9 = scmp.ne.s32.totalorder %s1207_s20, %s1208_s14  ;;  %p1214_p13 = scmp.lt.s32.totalorder %s1212_s25, %s1208_s14 }
 0x484   : > { %p1210_p10 = pnand %p1209_p9, %p1446_p2  ;;  %p1215_p0 = por %p1214_p13, %p1213_p12 }
 0x486   : > { %p1211_p11 = pneg %p1210_p10 }
 0x488   : > { %p1216_p5 = pnand %p1215_p0, %p1211_p11 }
 0x48a   : > { %1219 = shalt.err (!%p1216_p5)
}
 0x48b   : > { %956 = dma.vmem_to_hbm [thread:$0]  (%p1446_p2), %s788_s29, 128, %s790_s15, %s773_s9  }
 0x48c PF: > { %p983_p6 = scmp.ge.s32.totalorder %s1298_s28, 2  ;;  %s801_s7 = sand.u32 1, %s1270_s21  }
 0x48d   : > { %s802_s1 = scalar_lea.sflag [#allocation7], %s801_s7 }
 0x48e   : > { %p973_p7 = pnand %p983_p6, %p1450_p4 }
 0x490   : > { %p974_p3 = pneg %p973_p7 }
 0x492   : > { %1265 = dma.done.wait (%p974_p3), %s802_s1, 128  }
 0x493   : > { %1267 = vsyncadd (%p974_p3), %s802_s1, 4294967168  ;;  %s24_s28 = sadd.s32 1, %s1298_s28   ;;  %s1593_s24 = sld [smem:[#allocation18_spill]] }
 0x494   : > { %p21_p1 = scmp.ge.s32.totalorder %s24_s28, 6   ;;  %s1594_s26 = sld [smem:[#allocation19_spill]] }
 0x495   : > { %s1595_s21 = smov %s1274_s22  ;;  %s1596_s22 = smov %s1278_s23 }
 0x496   : > { %s1597_s23 = smov %s1459_s11  ;;  %s1598_s25 = smov %s1294_s27 }
 0x497   : > { %s1599_s27 = smov %s1605_s19  ;;  %23 = sbr.rel (!%p21_p1) target bundleno = 13 (0xd), region = 113 }
 0x49c   :  { %808 = vsyncpa [#allocation6], 1 }
 0x49d   :  { %810 = vsyncpa [#allocation6 + $0x1], 1 }
 0x49e   :  { %811 = vsyncpa [#allocation9], 1 }
 0x49f   :  { %812 = vsyncpa [#allocation12], 1 }
 0x4a0   :  { %813 = vsyncpa [#allocation7], 1 }
 0x4a1   :  { %815 = vsyncpa [#allocation7 + $0x1], 1 }

</bundles_post_ra>
